<compile_context>
chip_gen: v7x
topology: tpu7x:2x2x1
jax: 0.10.0
libtpu: 0.0.40
codegen_flags: <defaults>
</compile_context>

<pallas_src>
from functools import partial

import jax
import jax.numpy as jnp
from jax.experimental import pallas as pl
from jax.experimental.pallas import tpu as pltpu


def _round_up(v, m):
    return (v + m - 1) // m * m


# ------------------------------ Pallas kernel -------------------------------
def _make_kernel(H2, TW2, U_pad, C, CH):
    """Fused conv1+ReLU+conv2+ReLU for one (batch, time-tile) grid step."""
    MG = (H2 + 1) * U_pad        # conv1 rows per (row-parity, time-parity) group

    def kernel(a1_ref, w1_ref, w2_ref, b1_ref, b2_ref, o_ref, c1_ref):
        # a1_ref: (1, 1, 4*MG, 9)      conv1 im2col patches (compute dtype)
        # w1_ref: (9, C)               conv1 taps  [kh*3+kw, cout]
        # w2_ref: (9*C, C)             conv2 taps  [(kh*3+kw)*C + cin, cout]
        # b1_ref, b2_ref: (1, C)       biases (fp32)
        # o_ref : (1, H2, TW2, C)      output tile, channels last (lane dense)
        # c1_ref: (4, H2+1, U_pad, C)  conv1 activation scratch (compute dtype)
        #                              axis0 g = (h1 % 2) * 2 + (w1 % 2)

        # ---- conv_1 + ReLU: one MXU matmul (K = 9) per parity group --------
        # Result never leaves VMEM; bias/ReLU in f32, cast on the scratch store.
        for g in range(4):
            a = a1_ref[0, 0, g * MG:(g + 1) * MG, :]                 # (MG, 9)
            y = jnp.dot(a, w1_ref[...], preferred_element_type=jnp.float32)
            y = jnp.maximum(y + b1_ref[...], 0.0)                    # (MG, C) f32
            c1_ref[g] = y.reshape(H2 + 1, U_pad, C).astype(c1_ref.dtype)

        # ---- conv_2 + ReLU: fused-tap matmul (K = 9*C), h2 chunked ---------
        # All slice offsets are static; only the kw=2 taps read at sublane
        # offset 1 (cheap XLU shift, 3 slices per chunk).
        for h0 in range(0, H2, CH):
            ch = min(CH, H2 - h0)
            a2 = jnp.concatenate(
                [c1_ref[(kh % 2) * 2 + (kw % 2),
                        h0 + kh // 2:h0 + kh // 2 + ch,
                        kw // 2:kw // 2 + TW2, :]
                 for kh in range(3) for kw in range(3)],
                axis=-1)                                             # (ch, TW2, 9C)
            y = jnp.dot(a2.reshape(ch * TW2, 9 * C), w2_ref[...],
                        preferred_element_type=jnp.float32)          # (ch*TW2, C)
            y = jnp.maximum(y + b2_ref[...], 0.0)
            o_ref[0, h0:h0 + ch, :, :] = y.reshape(ch, TW2, C).astype(o_ref.dtype)

    return kernel


# ------------------------ ConvolutionSubsampling fwd ------------------------
@partial(jax.jit, static_argnames=("compute_dtype", "time_tile"))
def convolution_subsampling_forward(x, w1, b1, w2, b2, lengths=None, *,
                                    compute_dtype=jnp.float32, time_tile=128):
    """Matches PyTorch ConvolutionSubsampling.forward.

    x: (B, D, T) float32 -> ((B, T'', C*D''), lengths')
    """
    B, D, T = x.shape
    C = w1.shape[0]
    H1, W1 = (D - 3) // 2 + 1, (T - 3) // 2 + 1
    H2, W2 = (H1 - 3) // 2 + 1, (W1 - 3) // 2 + 1
    assert H1 >= 3 and W1 >= 3 and H2 >= 1 and W2 >= 1, "input too small"
    assert time_tile >= 8 and time_tile % 8 == 0, "time_tile must be a mult. of 8"

    # ---- output-time tiling (8-aligned so all kernel reshapes stay free) ----
    TW2 = time_tile if W2 > time_tile else _round_up(W2, 8)
    nt = pl.cdiv(W2, TW2)
    W2p = nt * TW2
    U_pad = TW2 + 8                 # conv1 time extent per tile (+1 halo, 8-padded)
    MG = (H2 + 1) * U_pad
    M1 = 4 * MG                     # conv1 im2col rows per tile
    CH = max(1, min(H2, 512 // TW2))  # conv2 h2-chunk: M = CH*TW2 ~ 512 rows

    # ---- conv1 im2col patches, built on the tiny 1-channel input -----------
    # A1[b, j, ((rp*2+tp)*(H2+1)+ri)*U_pad + u, kh*3+kw]
    #   = x[b, 2*(2*ri+rp)+kh, 2*(2*(j*TW2+u)+tp)+kw]
    H1e = 2 * (H2 + 1)              # conv1 output rows materialised (h1 = 2*ri+rp)
    W1e = 2 * (W2p + 8)             # conv1 output cols materialised (w1 = 2*wq+tp)
    Dp, Tp = 4 * H2 + 8, 4 * W2p + 36
    xpad = jnp.pad(x, ((0, 0), (0, Dp - D), (0, Tp - T)))
    P = jnp.stack([xpad[:, kh:kh + 2 * H1e:2, kw:kw + 2 * W1e:2]
                   for kh in range(3) for kw in range(3)], axis=1)   # (B,9,H1e,W1e)
    P = P.reshape(B, 9, H2 + 1, 2, W2p + 8, 2)      # (b, tap, ri, rp, wq, tp)
    P = P.transpose(0, 3, 5, 2, 4, 1)               # (b, rp, tp, ri, wq, tap)
    A1 = jnp.stack([P[:, :, :, :, j * TW2:j * TW2 + U_pad, :]        # 8-col halo
                    for j in range(nt)], axis=1)    # (b, nt, rp, tp, ri, u, tap)
    A1 = A1.reshape(B, nt, M1, 9).astype(compute_dtype)

    # ---- weights as matmul-ready matrices -----------------------------------
    w1t = w1.reshape(C, 9).transpose(1, 0).astype(compute_dtype)            # (9, C)
    w2t = w2.transpose(2, 3, 1, 0).reshape(9 * C, C).astype(compute_dtype)  # (9C, C)
    b1r = b1.reshape(1, C).astype(jnp.float32)
    b2r = b2.reshape(1, C).astype(jnp.float32)

    # ---- VMEM budget (lane-padded), capped at 48 MiB for v7x headroom -------
    cbytes = jnp.dtype(compute_dtype).itemsize
    Cl, C9l = max(C, 128), max(9 * C, 128)
    est = (2 * M1 * 128 * cbytes                       # A1 block (9->128 lanes), x2
           + 2 * 16 * Cl * cbytes                      # w1 block, x2
           + 2 * _round_up(9 * C, 8) * Cl * cbytes     # w2 block, x2
           + 2 * H2 * TW2 * Cl * 4                     # out block (f32), x2
           + 4 * (H2 + 1) * U_pad * Cl * cbytes        # conv1 scratch
           + 2 * MG * Cl * 4                           # conv1 f32 temp + cast copy
           + CH * TW2 * C9l * cbytes                   # conv2 concat temp
           + 2 * CH * TW2 * Cl * 4)                    # conv2 f32 result temp
    vmem_limit = int(min(48 * 2**20, max(16 * 2**20, int(1.4 * est) + (2 << 20))))

    kernel = _make_kernel(H2, TW2, U_pad, C, CH)
    out = pl.pallas_call(
        kernel,
        out_shape=jax.ShapeDtypeStruct((B, H2, W2p, C), jnp.float32),
        grid_spec=pltpu.PrefetchScalarGridSpec(
            num_scalar_prefetch=0,
            grid=(B, nt),
            in_specs=[
                pl.BlockSpec((1, 1, M1, 9), lambda b, j: (b, j, 0, 0)),
                pl.BlockSpec((9, C), lambda b, j: (0, 0)),
                pl.BlockSpec((9 * C, C), lambda b, j: (0, 0)),
                pl.BlockSpec((1, C), lambda b, j: (0, 0)),
                pl.BlockSpec((1, C), lambda b, j: (0, 0)),
            ],
            out_specs=pl.BlockSpec((1, H2, TW2, C), lambda b, j: (b, 0, j, 0)),
            scratch_shapes=[pltpu.VMEM((4, H2 + 1, U_pad, C), compute_dtype)],
        ),
        compiler_params=pltpu.CompilerParams(
            dimension_semantics=("parallel", "parallel"),
            vmem_limit_bytes=vmem_limit),
    )(A1, w1t, w2t, b1r, b2r)

    # (B, H2, W2p, C) -> (B, W2, C*H2): small transpose + free reshape on the
    # 4x-subsampled result, then drop time padding (matches torch permute+view).
    out = out.transpose(0, 2, 3, 1).reshape(B, W2p, C * H2)[:, :W2, :]

    if lengths is not None:
        lengths = ((lengths - 1) // 2 - 1) // 2
    return out, lengths


# ------------------------------ pure-JAX reference --------------------------
def _ref_forward(x, w1, b1, w2, b2, lengths=None):
    def conv(x, w, b):
        y = jax.lax.conv_general_dilated(
            x, w, window_strides=(2, 2), padding="VALID",
            dimension_numbers=("NCHW", "OIHW", "NCHW"))
        return jnp.maximum(y + b[None, :, None, None], 0.0)

    x = x[:, None, :, :]
    x = conv(x, w1, b1)
    x = conv(x, w2, b2)
    B, C, H2, W2 = x.shape
    x = x.transpose(0, 3, 1, 2).reshape(B, W2, C * H2)
    if lengths is not None:
        lengths = ((lengths - 1) // 2 - 1) // 2
    return x, lengths


if __name__ == "__main__":
    key = jax.random.PRNGKey(0)
    (k_x, k_w1, k_b1, k_w2, k_b2,
     k_x3, k_w13, k_b13, k_w23, k_b23) = jax.random.split(key, 10)

    # ---- case 1: toy module shapes (B=2, D=16, T=16, channels=4), fp32 ----
    B, D, T, C = 2, 16, 16, 4
    x = jax.random.normal(k_x, (B, D, T), dtype=jnp.float32)
    lengths = jnp.array([16, 12], dtype=jnp.int32)
    w1 = 0.1 * jax.random.normal(k_w1, (C, 1, 3, 3), dtype=jnp.float32)
    b1 = 0.1 * jax.random.normal(k_b1, (C,), dtype=jnp.float32)
    w2 = 0.1 * jax.random.normal(k_w2, (C, C, 3, 3), dtype=jnp.float32)
    b2 = 0.1 * jax.random.normal(k_b2, (C,), dtype=jnp.float32)

    out, out_len = convolution_subsampling_forward(x, w1, b1, w2, b2, lengths)
    out = jax.block_until_ready(out)
    out_len = jax.block_until_ready(out_len)
    ref_out, ref_len = _ref_forward(x, w1, b1, w2, b2, lengths)
    assert out.shape == ref_out.shape, (out.shape, ref_out.shape)
    assert jnp.allclose(out, ref_out, atol=1e-4, rtol=1e-4), "fp32 kernel mismatch"
    assert jnp.array_equal(out_len, ref_len), "lengths mismatch"

    # ---- case 2: same shapes, bf16 kernel-boundary cast (fp32 accumulation) -
    out_bf, _ = convolution_subsampling_forward(
        x, w1, b1, w2, b2, lengths, compute_dtype=jnp.bfloat16)
    out_bf = jax.block_until_ready(out_bf)
    assert jnp.allclose(out_bf, ref_out, atol=5e-2, rtol=5e-2), "bf16 kernel mismatch"

    # ---- case 3: longer sequence exercising the multi-tile grid/halo path ---
    B3, D3, T3, C3 = 2, 16, 150, 8
    x3 = jax.random.normal(k_x3, (B3, D3, T3), dtype=jnp.float32)
    w13 = 0.1 * jax.random.normal(k_w13, (C3, 1, 3, 3), dtype=jnp.float32)
    b13 = 0.1 * jax.random.normal(k_b13, (C3,), dtype=jnp.float32)
    w23 = 0.1 * jax.random.normal(k_w23, (C3, C3, 3, 3), dtype=jnp.float32)
    b23 = 0.1 * jax.random.normal(k_b23, (C3,), dtype=jnp.float32)
    len3 = jnp.array([150, 97], dtype=jnp.int32)

    out3, len3_out = convolution_subsampling_forward(
        x3, w13, b13, w23, b23, len3, time_tile=16)
    out3 = jax.block_until_ready(out3)
    ref3, ref_len3 = _ref_forward(x3, w13, b13, w23, b23, len3)
    assert out3.shape == ref3.shape, (out3.shape, ref3.shape)
    assert jnp.allclose(out3, ref3, atol=1e-4, rtol=1e-4), "tiled-path mismatch"
    assert jnp.array_equal(len3_out, ref_len3), "tiled-path lengths mismatch"

    print("KERNEL_OK")
</pallas_src>

<mosaic_0001>
module attributes {stable_mosaic.version = 11 : i64} {
  func.func @kernel(%arg0: i32, %arg1: i32, %arg2: memref<1x1x256x9xf32, #tpu.memory_space<vmem>>, %arg3: memref<9x4xf32, #tpu.memory_space<vmem>>, %arg4: memref<36x4xf32, #tpu.memory_space<vmem>>, %arg5: memref<1x4xf32, #tpu.memory_space<vmem>>, %arg6: memref<1x4xf32, #tpu.memory_space<vmem>>, %arg7: memref<1x3x8x4xf32, #tpu.memory_space<vmem>>, %arg8: memref<4x4x16x4xf32, #tpu.memory_space<vmem>>) attributes {dimension_semantics = [#tpu.dimension_semantics<parallel>, #tpu.dimension_semantics<parallel>], iteration_bounds = array<i64: 2, 1>, scalar_prefetch = 0 : i64, scratch_operands = 1 : i64, tpu.core_type = #tpu.core_type<tc>, window_params = [{transform_indices = @transform_0, window_bounds = array<i64: 1, 1, 256, 9>}, {pipeline_mode = #tpu.pipeline_mode<synchronous>, transform_indices = @transform_1, window_bounds = array<i64: 9, 4>}, {pipeline_mode = #tpu.pipeline_mode<synchronous>, transform_indices = @transform_2, window_bounds = array<i64: 36, 4>}, {pipeline_mode = #tpu.pipeline_mode<synchronous>, transform_indices = @transform_3, window_bounds = array<i64: 1, 4>}, {pipeline_mode = #tpu.pipeline_mode<synchronous>, transform_indices = @transform_4, window_bounds = array<i64: 1, 4>}, {transform_indices = @transform_5, window_bounds = array<i64: 1, 3, 8, 4>}]} {
    %c0 = arith.constant 0 : index
    %c0_0 = arith.constant 0 : index
    %c0_1 = arith.constant 0 : index
    %c0_2 = arith.constant 0 : index
    %0 = vector.load %arg2[%c0, %c0_0, %c0_1, %c0_2] : memref<1x1x256x9xf32, #tpu.memory_space<vmem>>, vector<1x1x64x9xf32>
    %1 = vector.shape_cast %0 : vector<1x1x64x9xf32> to vector<64x9xf32>
    %c0_3 = arith.constant 0 : index
    %c0_4 = arith.constant 0 : index
    %2 = vector.load %arg3[%c0_3, %c0_4] : memref<9x4xf32, #tpu.memory_space<vmem>>, vector<9x4xf32>
    %cst = arith.constant dense<0.000000e+00> : vector<64x4xf32>
    %3 = tpu.matmul %1, %2, %cst {dimension_numbers = #tpu.dot_dimension_numbers<[1], [0], [0], [1], [0, 0, 1, 1], [], []>} : vector<64x9xf32>, vector<9x4xf32>, vector<64x4xf32> -> vector<64x4xf32>
    %c0_5 = arith.constant 0 : index
    %c0_6 = arith.constant 0 : index
    %4 = vector.load %arg5[%c0_5, %c0_6] : memref<1x4xf32, #tpu.memory_space<vmem>>, vector<1x4xf32>
    %5 = vector.broadcast %4 : vector<1x4xf32> to vector<64x4xf32>
    %6 = arith.addf %3, %5 : vector<64x4xf32>
    %cst_7 = arith.constant 0.000000e+00 : f32
    %7 = vector.broadcast %cst_7 : f32 to vector<64x4xf32>
    %8 = arith.maximumf %6, %7 : vector<64x4xf32>
    %9 = vector.shape_cast %8 : vector<64x4xf32> to vector<4x16x4xf32>
    %c0_8 = arith.constant 0 : index
    %c0_9 = arith.constant 0 : index
    %c0_10 = arith.constant 0 : index
    %c0_11 = arith.constant 0 : index
    %10 = vector.load %arg8[%c0_8, %c0_9, %c0_10, %c0_11] : memref<4x4x16x4xf32, #tpu.memory_space<vmem>>, vector<1x4x16x4xf32>
    %11 = vector.shape_cast %10 : vector<1x4x16x4xf32> to vector<4x16x4xf32>
    %12 = vector.shape_cast %9 : vector<4x16x4xf32> to vector<1x4x16x4xf32>
    tpu.vector_store %arg8[%c0_8, %c0_9, %c0_10, %c0_11], %12 {strides = array<i32>} : memref<4x4x16x4xf32, #tpu.memory_space<vmem>>, vector<1x4x16x4xf32>,
    %c0_12 = arith.constant 0 : index
    %c0_13 = arith.constant 0 : index
    %c64 = arith.constant 64 : index
    %c0_14 = arith.constant 0 : index
    %13 = vector.load %arg2[%c0_12, %c0_13, %c64, %c0_14] : memref<1x1x256x9xf32, #tpu.memory_space<vmem>>, vector<1x1x64x9xf32>
    %14 = vector.shape_cast %13 : vector<1x1x64x9xf32> to vector<64x9xf32>
    %c0_15 = arith.constant 0 : index
    %c0_16 = arith.constant 0 : index
    %15 = vector.load %arg3[%c0_15, %c0_16] : memref<9x4xf32, #tpu.memory_space<vmem>>, vector<9x4xf32>
    %cst_17 = arith.constant dense<0.000000e+00> : vector<64x4xf32>
    %16 = tpu.matmul %14, %15, %cst_17 {dimension_numbers = #tpu.dot_dimension_numbers<[1], [0], [0], [1], [0, 0, 1, 1], [], []>} : vector<64x9xf32>, vector<9x4xf32>, vector<64x4xf32> -> vector<64x4xf32>
    %c0_18 = arith.constant 0 : index
    %c0_19 = arith.constant 0 : index
    %17 = vector.load %arg5[%c0_18, %c0_19] : memref<1x4xf32, #tpu.memory_space<vmem>>, vector<1x4xf32>
    %18 = vector.broadcast %17 : vector<1x4xf32> to vector<64x4xf32>
    %19 = arith.addf %16, %18 : vector<64x4xf32>
    %cst_20 = arith.constant 0.000000e+00 : f32
    %20 = vector.broadcast %cst_20 : f32 to vector<64x4xf32>
    %21 = arith.maximumf %19, %20 : vector<64x4xf32>
    %22 = vector.shape_cast %21 : vector<64x4xf32> to vector<4x16x4xf32>
    %c1 = arith.constant 1 : index
    %c0_21 = arith.constant 0 : index
    %c0_22 = arith.constant 0 : index
    %c0_23 = arith.constant 0 : index
    %23 = vector.load %arg8[%c1, %c0_21, %c0_22, %c0_23] : memref<4x4x16x4xf32, #tpu.memory_space<vmem>>, vector<1x4x16x4xf32>
    %24 = vector.shape_cast %23 : vector<1x4x16x4xf32> to vector<4x16x4xf32>
    %25 = vector.shape_cast %22 : vector<4x16x4xf32> to vector<1x4x16x4xf32>
    tpu.vector_store %arg8[%c1, %c0_21, %c0_22, %c0_23], %25 {strides = array<i32>} : memref<4x4x16x4xf32, #tpu.memory_space<vmem>>, vector<1x4x16x4xf32>,
    %c0_24 = arith.constant 0 : index
    %c0_25 = arith.constant 0 : index
    %c128 = arith.constant 128 : index
    %c0_26 = arith.constant 0 : index
    %26 = vector.load %arg2[%c0_24, %c0_25, %c128, %c0_26] : memref<1x1x256x9xf32, #tpu.memory_space<vmem>>, vector<1x1x64x9xf32>
    %27 = vector.shape_cast %26 : vector<1x1x64x9xf32> to vector<64x9xf32>
    %c0_27 = arith.constant 0 : index
    %c0_28 = arith.constant 0 : index
    %28 = vector.load %arg3[%c0_27, %c0_28] : memref<9x4xf32, #tpu.memory_space<vmem>>, vector<9x4xf32>
    %cst_29 = arith.constant dense<0.000000e+00> : vector<64x4xf32>
    %29 = tpu.matmul %27, %28, %cst_29 {dimension_numbers = #tpu.dot_dimension_numbers<[1], [0], [0], [1], [0, 0, 1, 1], [], []>} : vector<64x9xf32>, vector<9x4xf32>, vector<64x4xf32> -> vector<64x4xf32>
    %c0_30 = arith.constant 0 : index
    %c0_31 = arith.constant 0 : index
    %30 = vector.load %arg5[%c0_30, %c0_31] : memref<1x4xf32, #tpu.memory_space<vmem>>, vector<1x4xf32>
    %31 = vector.broadcast %30 : vector<1x4xf32> to vector<64x4xf32>
    %32 = arith.addf %29, %31 : vector<64x4xf32>
    %cst_32 = arith.constant 0.000000e+00 : f32
    %33 = vector.broadcast %cst_32 : f32 to vector<64x4xf32>
    %34 = arith.maximumf %32, %33 : vector<64x4xf32>
    %35 = vector.shape_cast %34 : vector<64x4xf32> to vector<4x16x4xf32>
    %c2 = arith.constant 2 : index
    %c0_33 = arith.constant 0 : index
    %c0_34 = arith.constant 0 : index
    %c0_35 = arith.constant 0 : index
    %36 = vector.load %arg8[%c2, %c0_33, %c0_34, %c0_35] : memref<4x4x16x4xf32, #tpu.memory_space<vmem>>, vector<1x4x16x4xf32>
    %37 = vector.shape_cast %36 : vector<1x4x16x4xf32> to vector<4x16x4xf32>
    %38 = vector.shape_cast %35 : vector<4x16x4xf32> to vector<1x4x16x4xf32>
    tpu.vector_store %arg8[%c2, %c0_33, %c0_34, %c0_35], %38 {strides = array<i32>} : memref<4x4x16x4xf32, #tpu.memory_space<vmem>>, vector<1x4x16x4xf32>,
    %c0_36 = arith.constant 0 : index
    %c0_37 = arith.constant 0 : index
    %c192 = arith.constant 192 : index
    %c0_38 = arith.constant 0 : index
    %39 = vector.load %arg2[%c0_36, %c0_37, %c192, %c0_38] : memref<1x1x256x9xf32, #tpu.memory_space<vmem>>, vector<1x1x64x9xf32>
    %40 = vector.shape_cast %39 : vector<1x1x64x9xf32> to vector<64x9xf32>
    %c0_39 = arith.constant 0 : index
    %c0_40 = arith.constant 0 : index
    %41 = vector.load %arg3[%c0_39, %c0_40] : memref<9x4xf32, #tpu.memory_space<vmem>>, vector<9x4xf32>
    %cst_41 = arith.constant dense<0.000000e+00> : vector<64x4xf32>
    %42 = tpu.matmul %40, %41, %cst_41 {dimension_numbers = #tpu.dot_dimension_numbers<[1], [0], [0], [1], [0, 0, 1, 1], [], []>} : vector<64x9xf32>, vector<9x4xf32>, vector<64x4xf32> -> vector<64x4xf32>
    %c0_42 = arith.constant 0 : index
    %c0_43 = arith.constant 0 : index
    %43 = vector.load %arg5[%c0_42, %c0_43] : memref<1x4xf32, #tpu.memory_space<vmem>>, vector<1x4xf32>
    %44 = vector.broadcast %43 : vector<1x4xf32> to vector<64x4xf32>
    %45 = arith.addf %42, %44 : vector<64x4xf32>
    %cst_44 = arith.constant 0.000000e+00 : f32
    %46 = vector.broadcast %cst_44 : f32 to vector<64x4xf32>
    %47 = arith.maximumf %45, %46 : vector<64x4xf32>
    %48 = vector.shape_cast %47 : vector<64x4xf32> to vector<4x16x4xf32>
    %c3 = arith.constant 3 : index
    %c0_45 = arith.constant 0 : index
    %c0_46 = arith.constant 0 : index
    %c0_47 = arith.constant 0 : index
    %49 = vector.load %arg8[%c3, %c0_45, %c0_46, %c0_47] : memref<4x4x16x4xf32, #tpu.memory_space<vmem>>, vector<1x4x16x4xf32>
    %50 = vector.shape_cast %49 : vector<1x4x16x4xf32> to vector<4x16x4xf32>
    %51 = vector.shape_cast %48 : vector<4x16x4xf32> to vector<1x4x16x4xf32>
    tpu.vector_store %arg8[%c3, %c0_45, %c0_46, %c0_47], %51 {strides = array<i32>} : memref<4x4x16x4xf32, #tpu.memory_space<vmem>>, vector<1x4x16x4xf32>,
    %c0_48 = arith.constant 0 : index
    %c0_49 = arith.constant 0 : index
    %c0_50 = arith.constant 0 : index
    %c0_51 = arith.constant 0 : index
    %52 = vector.load %arg8[%c0_48, %c0_49, %c0_50, %c0_51] : memref<4x4x16x4xf32, #tpu.memory_space<vmem>>, vector<1x3x8x4xf32>
    %53 = vector.shape_cast %52 : vector<1x3x8x4xf32> to vector<3x8x4xf32>
    %c1_52 = arith.constant 1 : index
    %c0_53 = arith.constant 0 : index
    %c0_54 = arith.constant 0 : index
    %c0_55 = arith.constant 0 : index
    %54 = vector.load %arg8[%c1_52, %c0_53, %c0_54, %c0_55] : memref<4x4x16x4xf32, #tpu.memory_space<vmem>>, vector<1x3x8x4xf32>
    %55 = vector.shape_cast %54 : vector<1x3x8x4xf32> to vector<3x8x4xf32>
    %c0_56 = arith.constant 0 : index
    %c0_57 = arith.constant 0 : index
    %c1_58 = arith.constant 1 : index
    %c0_59 = arith.constant 0 : index
    %56 = vector.load %arg8[%c0_56, %c0_57, %c1_58, %c0_59] : memref<4x4x16x4xf32, #tpu.memory_space<vmem>>, vector<1x3x8x4xf32>
    %57 = vector.shape_cast %56 : vector<1x3x8x4xf32> to vector<3x8x4xf32>
    %c2_60 = arith.constant 2 : index
    %c0_61 = arith.constant 0 : index
    %c0_62 = arith.constant 0 : index
    %c0_63 = arith.constant 0 : index
    %58 = vector.load %arg8[%c2_60, %c0_61, %c0_62, %c0_63] : memref<4x4x16x4xf32, #tpu.memory_space<vmem>>, vector<1x3x8x4xf32>
    %59 = vector.shape_cast %58 : vector<1x3x8x4xf32> to vector<3x8x4xf32>
    %c3_64 = arith.constant 3 : index
    %c0_65 = arith.constant 0 : index
    %c0_66 = arith.constant 0 : index
    %c0_67 = arith.constant 0 : index
    %60 = vector.load %arg8[%c3_64, %c0_65, %c0_66, %c0_67] : memref<4x4x16x4xf32, #tpu.memory_space<vmem>>, vector<1x3x8x4xf32>
    %61 = vector.shape_cast %60 : vector<1x3x8x4xf32> to vector<3x8x4xf32>
    %c2_68 = arith.constant 2 : index
    %c0_69 = arith.constant 0 : index
    %c1_70 = arith.constant 1 : index
    %c0_71 = arith.constant 0 : index
    %62 = vector.load %arg8[%c2_68, %c0_69, %c1_70, %c0_71] : memref<4x4x16x4xf32, #tpu.memory_space<vmem>>, vector<1x3x8x4xf32>
    %63 = vector.shape_cast %62 : vector<1x3x8x4xf32> to vector<3x8x4xf32>
    %c0_72 = arith.constant 0 : index
    %c1_73 = arith.constant 1 : index
    %c0_74 = arith.constant 0 : index
    %c0_75 = arith.constant 0 : index
    %64 = vector.load %arg8[%c0_72, %c1_73, %c0_74, %c0_75] : memref<4x4x16x4xf32, #tpu.memory_space<vmem>>, vector<1x3x8x4xf32>
    %65 = vector.shape_cast %64 : vector<1x3x8x4xf32> to vector<3x8x4xf32>
    %c1_76 = arith.constant 1 : index
    %c1_77 = arith.constant 1 : index
    %c0_78 = arith.constant 0 : index
    %c0_79 = arith.constant 0 : index
    %66 = vector.load %arg8[%c1_76, %c1_77, %c0_78, %c0_79] : memref<4x4x16x4xf32, #tpu.memory_space<vmem>>, vector<1x3x8x4xf32>
    %67 = vector.shape_cast %66 : vector<1x3x8x4xf32> to vector<3x8x4xf32>
    %c0_80 = arith.constant 0 : index
    %c1_81 = arith.constant 1 : index
    %c1_82 = arith.constant 1 : index
    %c0_83 = arith.constant 0 : index
    %68 = vector.load %arg8[%c0_80, %c1_81, %c1_82, %c0_83] : memref<4x4x16x4xf32, #tpu.memory_space<vmem>>, vector<1x3x8x4xf32>
    %69 = vector.shape_cast %68 : vector<1x3x8x4xf32> to vector<3x8x4xf32>
    %70 = tpu.concatenate %53, %55, %57, %59, %61, %63, %65, %67, %69 in 2 : vector<3x8x4xf32>, vector<3x8x4xf32>, vector<3x8x4xf32>, vector<3x8x4xf32>, vector<3x8x4xf32>, vector<3x8x4xf32>, vector<3x8x4xf32>, vector<3x8x4xf32>, vector<3x8x4xf32> -> vector<3x8x36xf32>
    %71 = vector.shape_cast %70 : vector<3x8x36xf32> to vector<24x36xf32>
    %c0_84 = arith.constant 0 : index
    %c0_85 = arith.constant 0 : index
    %72 = vector.load %arg4[%c0_84, %c0_85] : memref<36x4xf32, #tpu.memory_space<vmem>>, vector<36x4xf32>
    %cst_86 = arith.constant dense<0.000000e+00> : vector<24x4xf32>
    %73 = tpu.matmul %71, %72, %cst_86 {dimension_numbers = #tpu.dot_dimension_numbers<[1], [0], [0], [1], [0, 0, 1, 1], [], []>} : vector<24x36xf32>, vector<36x4xf32>, vector<24x4xf32> -> vector<24x4xf32>
    %c0_87 = arith.constant 0 : index
    %c0_88 = arith.constant 0 : index
    %74 = vector.load %arg6[%c0_87, %c0_88] : memref<1x4xf32, #tpu.memory_space<vmem>>, vector<1x4xf32>
    %75 = vector.broadcast %74 : vector<1x4xf32> to vector<24x4xf32>
    %76 = arith.addf %73, %75 : vector<24x4xf32>
    %cst_89 = arith.constant 0.000000e+00 : f32
    %77 = vector.broadcast %cst_89 : f32 to vector<24x4xf32>
    %78 = arith.maximumf %76, %77 : vector<24x4xf32>
    %79 = vector.shape_cast %78 : vector<24x4xf32> to vector<3x8x4xf32>
    %c0_90 = arith.constant 0 : index
    %c0_91 = arith.constant 0 : index
    %c0_92 = arith.constant 0 : index
    %c0_93 = arith.constant 0 : index
    %80 = vector.load %arg7[%c0_90, %c0_91, %c0_92, %c0_93] : memref<1x3x8x4xf32, #tpu.memory_space<vmem>>, vector<1x3x8x4xf32>
    %81 = vector.shape_cast %80 : vector<1x3x8x4xf32> to vector<3x8x4xf32>
    %82 = vector.shape_cast %79 : vector<3x8x4xf32> to vector<1x3x8x4xf32>
    tpu.vector_store %arg7[%c0_90, %c0_91, %c0_92, %c0_93], %82 {strides = array<i32>} : memref<1x3x8x4xf32, #tpu.memory_space<vmem>>, vector<1x3x8x4xf32>,
    return
  }
  func.func @transform_0(%arg0: i32, %arg1: i32) -> (i32, i32, i32, i32) {
    %c0_i32 = arith.constant 0 : i32
    %c0_i32_0 = arith.constant 0 : i32
    %c0_i32_1 = arith.constant 0 : i32
    return %arg0, %arg1, %c0_i32, %c0_i32_0 : i32, i32, i32, i32
  }
  func.func @transform_1(%arg0: i32, %arg1: i32) -> (i32, i32) {
    %c0_i32 = arith.constant 0 : i32
    %c0_i32_0 = arith.constant 0 : i32
    %c0_i32_1 = arith.constant 0 : i32
    return %c0_i32, %c0_i32_0 : i32, i32
  }
  func.func @transform_2(%arg0: i32, %arg1: i32) -> (i32, i32) {
    %c0_i32 = arith.constant 0 : i32
    %c0_i32_0 = arith.constant 0 : i32
    %c0_i32_1 = arith.constant 0 : i32
    return %c0_i32, %c0_i32_0 : i32, i32
  }
  func.func @transform_3(%arg0: i32, %arg1: i32) -> (i32, i32) {
    %c0_i32 = arith.constant 0 : i32
    %c0_i32_0 = arith.constant 0 : i32
    %c0_i32_1 = arith.constant 0 : i32
    return %c0_i32, %c0_i32_0 : i32, i32
  }
  func.func @transform_4(%arg0: i32, %arg1: i32) -> (i32, i32) {
    %c0_i32 = arith.constant 0 : i32
    %c0_i32_0 = arith.constant 0 : i32
    %c0_i32_1 = arith.constant 0 : i32
    return %c0_i32, %c0_i32_0 : i32, i32
  }
  func.func @transform_5(%arg0: i32, %arg1: i32) -> (i32, i32, i32, i32) {
    %c0_i32 = arith.constant 0 : i32
    %c0_i32_0 = arith.constant 0 : i32
    %c0_i32_1 = arith.constant 0 : i32
    return %arg0, %c0_i32, %arg1, %c0_i32_0 : i32, i32, i32, i32
  }
}

</mosaic_0001>

<bundles_post_ra>
// kernel: convolution_subsampling_forward.1
= control target key start
LH: loop header
LB: loop body
LE: loop exit
PB: predicated region body
PF: predicated region fallthrough
CT: control target
= control target key end

     0   :  { %s1601_s18 = smov 0   ;;  %s1603_s19 = smov 0   ;;  %s1868_s0 = inlined_call_operand.vmem [shape: f32[2,1,256,9], index: 0, kind: input, shape index: {}]   ;;  %s1869_s1 = inlined_call_operand.vmem [shape: f32[9,4], index: 1, kind: input, shape index: {}]   ;;  %s1870_s2 = inlined_call_operand.vmem [shape: f32[36,4], index: 2, kind: input, shape index: {}]   ;;  %s1871_s3 = inlined_call_operand.vmem [shape: f32[1,4], index: 3, kind: input, shape index: {}]   ;;  %s1872_s4 = inlined_call_operand.vmem [shape: f32[1,4], index: 4, kind: input, shape index: {}]   ;;  %s1873_s5 = inlined_call_operand.vmem [shape: f32[2,3,8,4], index: 5, kind: output, shape index: {}]  }
   0x1   :  { %s1605_s20 = smov 0  }
   0x2 LB: > { %s27_s21 = sadd.s32 1, %s1553_s19  ;;  %p1283_p0 = scmp.ge.s32.totalorder %s1557_s20, 1  ;;  %s1557_s20 = sphi %s1605_s20, %s15_s20   ;;  %s1553_s19 = sphi %s1603_s19, %s1877_s19   ;;  %s1549_s18 = sphi %s1601_s18, %s1876_s18  }
   0x3   : > { %p29_p1 = scmp.ge.s32.totalorder %s27_s21, 2  ;;  %p207_p2 = scmp.lt.s32.totalorder %s1557_s20, 3 }
   0x5   : > { %s1879_s21 = smov (%p29_p1, %s27_s21), 0  ;;  %p208_p3 = pnand %p1283_p0, %p207_p2 }
   0x6   : > { %v267_v0 = vld [vmem:[%s1869_s1] sm:$0xff] (!%p208_p3)  ;;  %v268_v1 = vld [vmem:[%s1869_s1 + $0x8] sm:$0x1] (!%p208_p3)  ;;  %vm301_vm0 = vcmask (!%p208_p3), 1040384   ;;  %p242_p4 = scmp.lt.s32.totalorder (!%p208_p3), %s1549_s18, 1  ;;  %vm1559_vm1 = vmmov (!%p208_p3), 1  }
   0x7   : > { %211 = sbr.rel (%p208_p3) target bundleno = 625 (0x271), region = 40  ;;  %v1466_v2 = vpack.c.bf16 (!%p208_p3), %v268_v1, %v267_v0  ;;  %vm1625_vm2 = vmpackc.low (!%p208_p3), %vm301_vm0, %vm1559_vm1  ;;  %v436_v4 = vld [vmem:[%s1869_s1 + $0x8] sm:$0x1] (!%p208_p3)  ;;  %vm276_vm3 = vcmask (!%p208_p3), 72704   ;;  %v1725_v38 = vld [vmem:[%s1871_s3] ss:$0 sm:$0xff] (!%p208_p3) }
   0x8   : > { %v602_v5 = vld [vmem:[%s1869_s1 + $0x8] sm:$0x1] (!%p208_p3)  ;;  %v1472_v6 = vpack.c.bf16 (!%p208_p3), %v436_v4, %v267_v0  ;;  %vm418_vm4 = vcmask (!%p208_p3), 31744   ;;  %s1560_s13 = smov (!%p208_p3), 8   ;;  %s1561_s14 = smov (!%p208_p3), 24   ;;  %vm1103_vm5 = vcmask (!%p208_p3), 1043456  }
   0x9   : > { %v1478_v7 = vpack.c.bf16 (!%p208_p3), %v602_v5, %v267_v0  ;;  %1468 = vmatprep.subr.msk.bf16.mxu0 (!%p208_p3), %vm1625_vm2, %v1466_v2  ;;  %1496 = vmatprep.subr.msk.bf16.mxu1 (!%p208_p3), %vm1625_vm2, %v1466_v2  ;;  %v768_v8 = vld [vmem:[%s1869_s1 + $0x8] sm:$0x1] (!%p208_p3)  ;;  %s1562_s15 = smov (!%p208_p3), 4   ;;  %s1563_s16 = smov (!%p208_p3), 32   ;;  %vm1569_vm6 = vmmov (!%p208_p3), 0   ;;  %vm1053_vm7 = vcmask (!%p208_p3), 64512  }
   0xa   : > { %1471 = vmatpush3.bf16.msk.msra.mxu0 (!%p208_p3), %vm1625_vm2, %v1466_v2  ;;  %1497 = vmatpush3.bf16.msk.msra.mxu1 (!%p208_p3), %vm1625_vm2, %v1466_v2  ;;  %v1484_v15 = vpack.c.bf16 (!%p208_p3), %v768_v8, %v267_v0  ;;  %s1564_s17 = smov (!%p208_p3), 28   ;;  %s1568_s6 = smov (!%p208_p3), 20   ;;  %vm1057_vm8 = vcmask (!%p208_p3), 97280   ;;  %vm1061_vm9 = vcmask (!%p208_p3), 130048   ;;  %vm1065_vm10 = vcmask (!%p208_p3), 162816  }
   0xb   : > { %1474 = vmatprep.subr.msk.bf16.mxu1 (!%p208_p3), %vm1625_vm2, %v1472_v6  ;;  %1480 = vmatprep.subr.msk.bf16.mxu0 (!%p208_p3), %vm1625_vm2, %v1478_v7  ;;  %s1570_s9 = smov (!%p208_p3), 16   ;;  %vm1069_vm11 = vcmask (!%p208_p3), 195584   ;;  %vm1073_vm12 = vcmask (!%p208_p3), 228352   ;;  %vm1077_vm13 = vcmask (!%p208_p3), 261120   ;;  %vm1093_vm14 = vcmask (!%p208_p3), 293888  }
   0xe   : > { %s1881_s18 = smov (!%p242_p4, %s1549_s18), 1 }
   0xf   : > { %s1334_s30 = sshll.u32 %s1881_s18, 8 }
  0x10   : > { %s1652_s10 = scalar_lea.vmem %s1868_s0, %s1334_s30  ;;  %s1566_s30 = smov 12  }
  0x11   : > { %v259_v9 = vld [vmem:[%s1652_s10] sm:$0xff]  ;;  %v265_v10 = vld [vmem:[%s1652_s10 + $0x30] sm:$0xff]  ;;  %v260_v11 = vld [vmem:[%s1652_s10 + $0x8] sm:$0xff] }
  0x12   : > { %1387 = vmatprep.mubr.msk.f32.mxu0 %vm276_vm3, %v259_v9  ;;  %1396 = vmatprep.mubr.msk.f32.mxu1 %vm276_vm3, %v265_v10  ;;  %v266_v12 = vld [vmem:[%s1652_s10 + $0x38] sm:$0xff]  ;;  %v261_v13 = vld [vmem:[%s1652_s10 + $0x10] sm:$0xff]  ;;  %v427_v14 = vld [vmem:[%s1652_s10 + $0x40] sm:$0xff] }
  0x13   : > { %1388 = vmatmul.mubr.msk.f32.vlgmr.msra.gmra.mrb[0].mxu0 %vm276_vm3, %v260_v11  ;;  %1397 = vmatmul.mubr.msk.f32.vlgmr.msra.gmra.mrb[0].mxu1 %vm276_vm3, %v266_v12  ;;  %v262_v16 = vld [vmem:[%s1652_s10 + $0x18] sm:$0xff]  ;;  %v428_v17 = vld [vmem:[%s1652_s10 + $0x48] sm:$0xff]  ;;  %v429_v18 = vld [vmem:[%s1652_s10 + $0x50] sm:$0xff] }
  0x14   : > { %1477 = vmatpush3.bf16.msk.msra.mxu1 %vm1625_vm2, %v1472_v6  ;;  %1390 = vmatprep.mubr.msk.f32.mxu0 %vm276_vm3, %v261_v13  ;;  %v263_v19 = vld [vmem:[%s1652_s10 + $0x20] sm:$0xff]  ;;  %v430_v20 = vld [vmem:[%s1652_s10 + $0x58] sm:$0xff]  ;;  %v264_v21 = vld [vmem:[%s1652_s10 + $0x28] sm:$0xff] }
  0x15   : > { %1403 = vmatprep.mubr.msk.f32.mxu1 %vm276_vm3, %v427_v14  ;;  %1483 = vmatpush3.bf16.msk.msra.mxu0 %vm1625_vm2, %v1478_v7  ;;  %v593_v22 = vld [vmem:[%s1652_s10 + $0x80] sm:$0xff]  ;;  %v594_v24 = vld [vmem:[%s1652_s10 + $0x88] sm:$0xff]  ;;  %v595_v26 = vld [vmem:[%s1652_s10 + $0x90] sm:$0xff] }
  0x16   : > { %1486 = vmatprep.subr.msk.bf16.mxu1 %vm1625_vm2, %v1484_v15  ;;  %v431_v23 = vld [vmem:[%s1652_s10 + $0x60] sm:$0xff]  ;;  %v432_v25 = vld [vmem:[%s1652_s10 + $0x68] sm:$0xff]  ;;  %v433_v27 = vld [vmem:[%s1652_s10 + $0x70] sm:$0xff] }
  0x17   : > { %1391 = vmatmul.mubr.msk.f32.gmra.mrb[2].mxu0 %vm276_vm3, %v262_v16  ;;  %1404 = vmatmul.mubr.msk.f32.vlgmr.msra.gmra.mrb[2].mxu1 %vm276_vm3, %v428_v17  ;;  %v596_v28 = vld [vmem:[%s1652_s10 + $0x98] sm:$0xff]  ;;  %v597_v30 = vld [vmem:[%s1652_s10 + $0xa0] sm:$0xff]  ;;  %v598_v32 = vld [vmem:[%s1652_s10 + $0xa8] sm:$0xff] }
  0x18   : > { %1406 = vmatprep.mubr.msk.f32.mxu1 %vm276_vm3, %v429_v18  ;;  %1393 = vmatprep.mubr.msk.f32.mxu0 %vm276_vm3, %v263_v19  ;;  %v434_v29 = vld [vmem:[%s1652_s10 + $0x78] sm:$0xff]  ;;  %v759_v31 = vld [vmem:[%s1652_s10 + $0xc0] sm:$0xff]  ;;  %v760_v33 = vld [vmem:[%s1652_s10 + $0xc8] sm:$0xff] }
  0x19   : > { %1489 = vmatpush3.bf16.msk.msra.mxu1 %vm1625_vm2, %v1484_v15  ;;  %v761_v34 = vld [vmem:[%s1652_s10 + $0xd0] sm:$0xff]  ;;  %v762_v35 = vld [vmem:[%s1652_s10 + $0xd8] sm:$0xff]  ;;  %v763_v36 = vld [vmem:[%s1652_s10 + $0xe0] sm:$0xff] }
  0x1a   : > { %v764_v37 = vld [vmem:[%s1652_s10 + $0xe8] sm:$0xff] }
  0x1b   : > { %1407 = vmatmul.mubr.msk.f32.gmra.mrb[4].mxu1 %vm276_vm3, %v430_v20  ;;  %1394 = vmatmul.mubr.msk.f32.gmra.mrb[4].mxu0 %vm276_vm3, %v264_v21 }
  0x1c   : > { %1419 = vmatprep.mubr.msk.f32.mxu0 %vm276_vm3, %v593_v22  ;;  %1409 = vmatprep.mubr.msk.f32.mxu1 %vm276_vm3, %v431_v23 }
  0x1f   : > { %1420 = vmatmul.mubr.msk.f32.vlgmr.msra.gmra.mrb[6].mxu0 %vm276_vm3, %v594_v24  ;;  %1410 = vmatmul.mubr.msk.f32.gmra.mrb[6].mxu1 %vm276_vm3, %v432_v25 }
  0x20   : > { %1422 = vmatprep.mubr.msk.f32.mxu0 %vm276_vm3, %v595_v26  ;;  %1412 = vmatprep.mubr.msk.f32.mxu1 %vm276_vm3, %v433_v27 }
  0x23   : > { %1423 = vmatmul.mubr.msk.f32.gmra.mrb[8].mxu0 %vm276_vm3, %v596_v28  ;;  %1413 = vmatmul.mubr.msk.f32.gmra.mrb[8].mxu1 %vm276_vm3, %v434_v29 }
  0x24   : > { %1425 = vmatprep.mubr.msk.f32.mxu0 %vm276_vm3, %v597_v30  ;;  %1435 = vmatprep.mubr.msk.f32.mxu1 %vm276_vm3, %v759_v31 }
  0x27   : > { %1426 = vmatmul.mubr.msk.f32.gmra.mrb[10].mxu0 %vm276_vm3, %v598_v32  ;;  %1436 = vmatmul.mubr.msk.f32.vlgmr.msra.gmra.mrb[10].mxu1 %vm276_vm3, %v760_v33 }
  0x28   : > { %1438 = vmatprep.mubr.msk.f32.mxu1 %vm276_vm3, %v761_v34 }
  0x2b   : > { %1439 = vmatmul.mubr.msk.f32.gmra.mrb[12].mxu1 %vm276_vm3, %v762_v35 }
  0x2c   : > { %1441 = vmatprep.mubr.msk.f32.mxu1 %vm276_vm3, %v763_v36 }
  0x2f   : > { %1442 = vmatmul.mubr.msk.f32.gmra.mrb[14].mxu1 %vm276_vm3, %v764_v37 }
  0xe6   : > { %v1389_v39 = vpop.f32.mrb[0].mxu0  ;;  %v1398_v40 = vpop.f32.mrb[0].mxu1 }
  0xe7   : > { %v377_v41 = vadd.f32 %v1389_v39, %v1725_v38  ;;  %v371_v42 = vpop.f32.mrb[1].mxu0  ;;  %v407_v43 = vadd.f32 %v1398_v40, %v1725_v38  ;;  %v401_v44 = vpop.f32.mrb[1].mxu1 }
  0xe8   : > { %v372_v45 = vadd.f32 %v1725_v38, %v371_v42  ;;  %v402_v46 = vadd.f32 %v1725_v38, %v401_v44 }
  0xe9   : > { %v411_v47 = vmax.f32 %v377_v41, 0.0  ;;  %v417_v48 = vmax.f32 %v407_v43, 0.0 }
  0xea   : > { %v410_v49 = vmax.f32 %v372_v45, 0.0  ;;  %v416_v50 = vmax.f32 %v402_v46, 0.0  ;;  %v1392_v51 = vpop.f32.mrb[2].mxu0  ;;  %v1405_v52 = vpop.f32.mrb[2].mxu1  ;;  %v1081_v46 = vld [vmem:[%s1870_s2] sm:$0xff] }
  0xeb   : > { %420 = vst.msk [vmem:[#allocation2 + $0x8] sm:$0xff] %vm418_vm4, %v411_v47  ;;  %426 = vst.msk [vmem:[#allocation2 + $0x38] sm:$0xff] %vm418_vm4, %v417_v48  ;;  %v387_v53 = vadd.f32 %v1392_v51, %v1725_v38  ;;  %v381_v54 = vpop.f32.mrb[3].mxu0  ;;  %v537_v55 = vpop.f32.mrb[3].mxu1  ;;  %v1082_v47 = vld [vmem:[%s1870_s2 + $0x8] sm:$0xff] }
  0xec   : > { %419 = vst.msk [vmem:[#allocation2] sm:$0xff] %vm418_vm4, %v410_v49  ;;  %425 = vst.msk [vmem:[#allocation2 + $0x30] sm:$0xff] %vm418_vm4, %v416_v50  ;;  %v382_v56 = vadd.f32 %v1725_v38, %v381_v54  ;;  %v538_v57 = vadd.f32 %v1725_v38, %v537_v55  ;;  %v1565_v50 = vmov 0.0|0.0   ;;  %v1491_v51 = vpack.c.bf16 %v1082_v47, %v1081_v46 }
  0xed   : > { %v413_v58 = vmax.f32 %v387_v53, 0.0  ;;  %1490 = vmatprep.subr.bf16.mxu0 %v1565_v50 }
  0xee   : > { %v412_v59 = vmax.f32 %v382_v56, 0.0  ;;  %v576_v60 = vmax.f32 %v538_v57, 0.0  ;;  %v1408_v61 = vpop.f32.mrb[4].mxu1  ;;  %v1395_v62 = vpop.f32.mrb[4].mxu0  ;;  %1492 = vmatpush3.bf16.msra.mxu0 %v1491_v51  ;;  %v1083_v56 = vld [vmem:[%s1870_s2 + $0x10] sm:$0xff]  ;;  %v1084_v57 = vld [vmem:[%s1870_s2 + $0x18] sm:$0xff] }
  0xef   : > { %422 = vst.msk [vmem:[#allocation2 + $0x18] sm:$0xff] %vm418_vm4, %v413_v58  ;;  %v547_v63 = vpop.f32.mrb[5].mxu1  ;;  %v397_v0 = vadd.f32 %v1395_v62, %v1725_v38  ;;  %v391_v1 = vpop.f32.mrb[5].mxu0  ;;  %1493 = vmatprep.subr.bf16.mxu0 %v1565_v50  ;;  %v599_v62 = vld [vmem:[%s1652_s10 + $0xb0] sm:$0xff] }
  0xf0   : > { %421 = vst.msk [vmem:[#allocation2 + $0x10] sm:$0xff] %vm418_vm4, %v412_v59  ;;  %585 = vst.msk [vmem:[#allocation2 + $0x40] sm:$0xff] %vm418_vm4, %v576_v60  ;;  %v548_v2 = vadd.f32 %v1725_v38, %v547_v63  ;;  %v392_v3 = vadd.f32 %v1725_v38, %v391_v1  ;;  %v1494_v60 = vpack.c.bf16 %v1084_v57, %v1083_v56  ;;  %1428 = vmatprep.mubr.msk.f32.mxu0 %vm276_vm3, %v599_v62  ;;  %v1567_v63 = vmov 0.0   ;;  %v600_v1 = vld [vmem:[%s1652_s10 + $0xb8] sm:$0xff] }
  0xf1   : > { %v415_v4 = vmax.f32 %v397_v0, 0.0  ;;  %1429 = vmatmul.mubr.msk.f32.gmra.mrb[12].mxu0 %vm276_vm3, %v600_v1 }
  0xf2   : > { %v578_v5 = vmax.f32 %v548_v2, 0.0  ;;  %v414_v6 = vmax.f32 %v392_v3, 0.0  ;;  %v1421_v7 = vpop.f32.mrb[6].mxu0  ;;  %v1411_v8 = vpop.f32.mrb[6].mxu1  ;;  %1495 = vmatpush3.bf16.msra.mxu0 %v1494_v60  ;;  %v1085_v3 = vld [vmem:[%s1870_s2 + $0x20] sm:$0xf]  ;;  %1457 = vmatprep.mubr.msk.f32.mxu0 %vm1569_vm6, %v1567_v63 }
  0xf3   : > { %v931_v9 = vld [vmem:[#allocation2 + $0x1] sm:$0xff]  ;;  %424 = vst.msk [vmem:[#allocation2 + $0x28] sm:$0xff] %vm418_vm4, %v415_v4  ;;  %v709_v10 = vadd.f32 %v1421_v7, %v1725_v38  ;;  %v703_v11 = vpop.f32.mrb[7].mxu0  ;;  %v557_v12 = vpop.f32.mrb[7].mxu1  ;;  %1455 = vmatprep.subr.mxu0 %v1567_v63  ;;  %v766_v7 = vld [vmem:[%s1652_s10 + $0xf8] sm:$0xff] }
  0xf4   : > { %587 = vst.msk [vmem:[#allocation2 + $0x50] sm:$0xff] %vm418_vm4, %v578_v5  ;;  %969 = vrot.lane.b32.xlu0 %v931_v9, %s1560_s13  ;;  %423 = vst.msk [vmem:[#allocation2 + $0x20] sm:$0xff] %vm418_vm4, %v414_v6  ;;  %v704_v13 = vadd.f32 %v1725_v38, %v703_v11  ;;  %v558_v14 = vadd.f32 %v1725_v38, %v557_v12  ;;  %v765_v6 = vld [vmem:[%s1652_s10 + $0xf0] sm:$0xff]  ;;  %s1498_s10 = smul.u32 24, %s1881_s18 }
  0xf5   : > { %v743_v15 = vmax.f32 %v709_v10, 0.0  ;;  %1444 = vmatprep.mubr.msk.f32.mxu1 %vm276_vm3, %v765_v6  ;;  %v946_v11 = vld [vmem:[#allocation2 + $0x30] sm:$0xff] }
  0xf6   : > { %v742_v16 = vmax.f32 %v704_v13, 0.0  ;;  %v580_v17 = vmax.f32 %v558_v14, 0.0  ;;  %v1424_v18 = vpop.f32.mrb[8].mxu0  ;;  %v1414_v19 = vpop.f32.mrb[8].mxu1  ;;  %1456 = vmatpush3.msk.msra.mxu0 %vm1103_vm5, %v1085_v3  ;;  %1445 = vmatmul.mubr.msk.f32.gmra.mrb[16].mxu1 %vm276_vm3, %v766_v7  ;;  %v953_v13 = vld [vmem:[#allocation2 + $0x31] sm:$0xff] }
  0xf7   : > { %v1751_v20 = vld [vmem:[#allocation2 + $0x10] sm:$0xff]  ;;  %v928_v21 = vld [vmem:[#allocation2 + $0x40] sm:$0xff]  ;;  %752 = vst.msk [vmem:[#allocation2 + $0x88] sm:$0xff] %vm418_vm4, %v743_v15  ;;  %v719_v22 = vadd.f32 %v1424_v18, %v1725_v38  ;;  %v713_v23 = vpop.f32.mrb[9].mxu0  ;;  %v567_v24 = vpop.f32.mrb[9].mxu1 }
  0xf8   : > { %1017 = vrot.lane.b32.xlu1 %v1751_v20, %s1561_s14  ;;  %957 = vrot.lane.b32.xlu0 %v928_v21, %s1562_s15  ;;  %751 = vst.msk [vmem:[#allocation2 + $0x80] sm:$0xff] %vm418_vm4, %v742_v16  ;;  %589 = vst.msk [vmem:[#allocation2 + $0x60] sm:$0xff] %vm418_vm4, %v580_v17  ;;  %v714_v25 = vadd.f32 %v1725_v38, %v713_v23  ;;  %v568_v26 = vadd.f32 %v1725_v38, %v567_v24  ;;  %v951_v32 = vld [vmem:[#allocation2 + $0x11] sm:$0xff] }
  0xf9   : > { %v745_v27 = vmax.f32 %v719_v22, 0.0 }
  0xfa   : > { %v744_v28 = vmax.f32 %v714_v25, 0.0  ;;  %v1427_v29 = vpop.f32.mrb[10].mxu0  ;;  %v582_v30 = vmax.f32 %v568_v26, 0.0  ;;  %v1437_v31 = vpop.f32.mrb[10].mxu1 }
  0xfb   : > { %754 = vst.msk [vmem:[#allocation2 + $0x98] sm:$0xff] %vm418_vm4, %v745_v27  ;;  %v729_v33 = vadd.f32 %v1427_v29, %v1725_v38  ;;  %v723_v34 = vpop.f32.mrb[11].mxu0  ;;  %v869_v35 = vpop.f32.mrb[11].mxu1  ;;  %v948_v39 = vld [vmem:[#allocation2 + $0x50] sm:$0xff]  ;;  %v1782_v48 = vld [vmem:[#allocation2 + $0x20] sm:$0xff] }
  0xfc   : > { %1041 = vrot.lane.b32.xlu1 %v951_v32, %s1563_s16  ;;  %971 = vrot.lane.b32.xlu0 %v951_v32, %s1560_s13  ;;  %753 = vst.msk [vmem:[#allocation2 + $0x90] sm:$0xff] %vm418_vm4, %v744_v28  ;;  %v724_v36 = vadd.f32 %v1725_v38, %v723_v34  ;;  %591 = vst.msk [vmem:[#allocation2 + $0x70] sm:$0xff] %vm418_vm4, %v582_v30  ;;  %v870_v37 = vadd.f32 %v1725_v38, %v869_v35  ;;  %v933_v49 = vld [vmem:[#allocation2 + $0x21] sm:$0xff] }
  0xfd   : > { %v747_v40 = vmax.f32 %v729_v33, 0.0  ;;  %v925_v30 = vld [vmem:[#allocation2] sm:$0xff] }
  0xfe   : > { %v746_v41 = vmax.f32 %v724_v36, 0.0  ;;  %v908_v42 = vmax.f32 %v870_v37, 0.0  ;;  %v1440_v43 = vpop.f32.mrb[12].mxu1 }
  0xff   : > { %756 = vst.msk [vmem:[#allocation2 + $0xa8] sm:$0xff] %vm418_vm4, %v747_v40  ;;  %v879_v44 = vpop.f32.mrb[13].mxu1  ;;  %v934_v58 = vld [vmem:[#allocation2 + $0x80] sm:$0xff] }
 0x100   : > { %1029 = vrot.lane.b32.xlu1 %v948_v39, %s1564_s17  ;;  %959 = vrot.lane.b32.xlu0 %v948_v39, %s1562_s15  ;;  %755 = vst.msk [vmem:[#allocation2 + $0xa0] sm:$0xff] %vm418_vm4, %v746_v41  ;;  %917 = vst.msk [vmem:[#allocation2 + $0xc0] sm:$0xff] %vm418_vm4, %v908_v42  ;;  %v880_v45 = vadd.f32 %v1725_v38, %v879_v44  ;;  %v930_v59 = vld [vmem:[#allocation2 + $0x60] sm:$0xff] }
 0x101   : > { %v940_v0 = vld [vmem:[#allocation2 + $0x81] sm:$0xff] }
 0x102   : > { %v910_v52 = vmax.f32 %v880_v45, 0.0  ;;  %v1443_v53 = vpop.f32.mrb[14].mxu1 }
 0x103   : > { %v889_v54 = vpop.f32.mrb[15].mxu1  ;;  %v941_v4 = vld [vmem:[#allocation2 + $0x91] sm:$0xff] }
 0x104   : > { %1019 = vrot.lane.b32.xlu1 %v1782_v48, %s1561_s14  ;;  %973 = vrot.lane.b32.xlu0 %v933_v49, %s1560_s13  ;;  %919 = vst.msk [vmem:[#allocation2 + $0xd0] sm:$0xff] %vm418_vm4, %v910_v52  ;;  %v890_v55 = vadd.f32 %v1725_v38, %v889_v54  ;;  %v935_v38 = vld [vmem:[#allocation2 + $0x90] sm:$0xff] }
 0x105   : > { %v950_v12 = vld [vmem:[#allocation2 + $0x70] sm:$0xff] }
 0x106   : > { %v912_v61 = vmax.f32 %v890_v55, 0.0 }
 0x107   : > { %v936_v2 = vld [vmem:[#allocation2 + $0xa0] sm:$0xff] }
 0x108   : > { %981 = vrot.lane.b32.xlu1 %v934_v58, %s1566_s30  ;;  %961 = vrot.lane.b32.xlu0 %v930_v59, %s1562_s15  ;;  %921 = vst.msk [vmem:[#allocation2 + $0xe0] sm:$0xff] %vm418_vm4, %v912_v61  ;;  %v942_v5 = vld [vmem:[#allocation2 + $0xa1] sm:$0xff]  ;;  %s258_s15 = scalar_lea.vmem %s1873_s5, %s1498_s10 }
 0x109   : > { %v937_v9 = vld [vmem:[#allocation2 + $0xc0] sm:$0xff] }
 0x10b   : > { %v938_v8 = vld [vmem:[#allocation2 + $0xd0] sm:$0xff] }
 0x10c   : > { %1005 = vrot.lane.b32.xlu1 %v940_v0, %s1568_s6  ;;  %983 = vrot.lane.b32.xlu0 %v935_v38, %s1566_s30 }
 0x10f   : > { %v939_v10 = vld [vmem:[#allocation2 + $0xe0] sm:$0xff] }
 0x110   : > { %1031 = vrot.lane.b32.xlu1 %v930_v59, %s1564_s17  ;;  %985 = vrot.lane.b32.xlu0 %v936_v2, %s1566_s30 }
 0x114   : > { %1007 = vrot.lane.b32.xlu1 %v941_v4, %s1568_s6  ;;  %1009 = vrot.lane.b32.xlu0 %v942_v5, %s1568_s6  ;;  %v1327_v4 = vld [vmem:[%s1872_s4] ss:$0 sm:$0xff] }
 0x118   : > { %993 = vrot.lane.b32.xlu1 %v937_v9, %s1570_s9  ;;  %995 = vrot.lane.b32.xlu0 %v938_v8, %s1570_s9 }
 0x11c   : > { %1043 = vrot.lane.b32.xlu1 %v933_v49, %s1563_s16  ;;  %997 = vrot.lane.b32.xlu0 %v939_v10, %s1570_s9 }
 0x120   : > { %1021 = vrot.lane.b32.xlu1 %v946_v11, %s1561_s14  ;;  %1033 = vrot.lane.b32.xlu0 %v950_v12, %s1564_s17 }
 0x124   : > { %1045 = vrot.lane.b32.xlu1 %v953_v13, %s1563_s16 }
 0x166   : > { %v970_v14 = vpop.permute.xlu0 %969 }
 0x16a   : > { %v1018_v15 = vpop.permute.xlu1 %1017  ;;  %v958_v16 = vpop.permute.xlu0 %957 }
 0x16b   : > { %v1050_v31 = vsel %vm418_vm4, %v925_v30, %v958_v16 }
 0x16c   : > { %v1054_v35 = vsel %vm1053_vm7, %v1050_v31, %v970_v14 }
 0x16e   : > { %v1042_v17 = vpop.permute.xlu1 %1041  ;;  %v972_v18 = vpop.permute.xlu0 %971 }
 0x172   : > { %v1030_v19 = vpop.permute.xlu1 %1029  ;;  %v960_v21 = vpop.permute.xlu0 %959 }
 0x173   : > { %v1051_v32 = vsel %vm418_vm4, %v1751_v20, %v960_v21 }
 0x174   : > { %v1055_v36 = vsel %vm1053_vm7, %v1051_v32, %v972_v18 }
 0x176   : > { %v1020_v22 = vpop.permute.xlu1 %1019  ;;  %v974_v23 = vpop.permute.xlu0 %973 }
 0x17a   : > { %v982_v24 = vpop.permute.xlu1 %981  ;;  %v962_v25 = vpop.permute.xlu0 %961 }
 0x17b   : > { %v1058_v37 = vsel %vm1057_vm8, %v1054_v35, %v982_v24  ;;  %v1052_v39 = vsel %vm418_vm4, %v1782_v48, %v962_v25 }
 0x17c   : > { %v1056_v46 = vsel %vm1053_vm7, %v1052_v39, %v974_v23 }
 0x17e   : > { %v1006_v26 = vpop.permute.xlu1 %1005  ;;  %v984_v27 = vpop.permute.xlu0 %983 }
 0x17f   : > { %v1059_v40 = vsel %vm1057_vm8, %v1055_v36, %v984_v27 }
 0x182   : > { %v1032_v28 = vpop.permute.xlu1 %1031  ;;  %v986_v29 = vpop.permute.xlu0 %985 }
 0x183   : > { %v1060_v49 = vsel %vm1057_vm8, %v1056_v46, %v986_v29 }
 0x186   : > { %v1008_v33 = vpop.permute.xlu1 %1007  ;;  %v1010_v34 = vpop.permute.xlu0 %1009 }
 0x18a   : > { %v994_v41 = vpop.permute.xlu1 %993  ;;  %v996_v20 = vpop.permute.xlu0 %995 }
 0x18b   : > { %v1062_v42 = vsel %vm1061_vm9, %v1058_v37, %v994_v41  ;;  %v1063_v43 = vsel %vm1061_vm9, %v1059_v40, %v996_v20 }
 0x18c   : > { %v1066_v44 = vsel %vm1065_vm10, %v1062_v42, %v1006_v26  ;;  %v1067_v45 = vsel %vm1065_vm10, %v1063_v43, %v1008_v33 }
 0x18d   : > { %v1070_v47 = vsel %vm1069_vm11, %v1066_v44, %v1018_v15  ;;  %v1071_v48 = vsel %vm1069_vm11, %v1067_v45, %v1020_v22 }
 0x18e   : > { %v1044_v50 = vpop.permute.xlu1 %1043  ;;  %v1074_v51 = vsel %vm1073_vm12, %v1070_v47, %v1030_v19  ;;  %v998_v52 = vpop.permute.xlu0 %997  ;;  %v1075_v55 = vsel %vm1073_vm12, %v1071_v48, %v1032_v28 }
 0x18f   : > { %v1078_v53 = vsel %vm1077_vm13, %v1074_v51, %v1042_v17  ;;  %v1064_v54 = vsel %vm1061_vm9, %v1060_v49, %v998_v52  ;;  %v1079_v58 = vsel %vm1077_vm13, %v1075_v55, %v1044_v50 }
 0x190   : > { %1458 = vmatmul.mubr.msk.f32.vlgmr.msra.gmra.mrb[14].mxu0 %vm1093_vm14, %v1078_v53  ;;  %v1068_v57 = vsel %vm1065_vm10, %v1064_v54, %v1010_v34 }
 0x191   : > { %1460 = vmatprep.mubr.msk.f32.mxu0 %vm1569_vm6, %v1567_v63 }
 0x192   : > { %v1022_v56 = vpop.permute.xlu1 %1021  ;;  %v1034_v60 = vpop.permute.xlu0 %1033 }
 0x193   : > { %v1072_v59 = vsel %vm1069_vm11, %v1068_v57, %v1022_v56 }
 0x194   : > { %1461 = vmatmul.mubr.msk.f32.gmra.mrb[16].mxu0 %vm1093_vm14, %v1079_v58  ;;  %v1076_v61 = vsel %vm1073_vm12, %v1072_v59, %v1034_v60 }
 0x195   : > { %1463 = vmatprep.mubr.msk.f32.mxu0 %vm1569_vm6, %v1567_v63 }
 0x196   : > { %v1046_v62 = vpop.permute.xlu1 %1045 }
 0x197   : > { %v1080_v38 = vsel %vm1077_vm13, %v1076_v61, %v1046_v62 }
 0x198   : > { %1464 = vmatmul.mubr.msk.f32.gmra.mrb[18].mxu0 %vm1093_vm14, %v1080_v38 }
 0x1c4   : > { %v1430_v0 = vpop.f32.mrb[12].mxu0 }
 0x1c5   : > { %v733_v1 = vpop.f32.mrb[13].mxu0 }
 0x1c9   : > { %v1446_v2 = vpop.f32.mrb[16].mxu1 }
 0x1ca   : > { %v899_v3 = vpop.f32.mrb[17].mxu1 }
 0x263   : > { %v1173_v5 = vpop.f32.mrb[14].mxu0 }
 0x264   : > { %v1174_v6 = vadd.f32 %v1327_v4, %v1173_v5  ;;  %v1459_v7 = vpop.f32.mrb[15].mxu0 }
 0x266   : > { %v1187_v63 = vmax.f32 %v1174_v6, 0.0 }
 0x267   : > { %v1178_v8 = vpop.f32.mrb[16].mxu0 }
 0x268   : > { %1190 = vst.msk [vmem:[%s258_s15] sm:$0xff] %vm418_vm4, %v1187_v63  ;;  %v1179_v9 = vadd.f32 %v1327_v4, %v1178_v8  ;;  %v1462_v10 = vpop.f32.mrb[17].mxu0 }
 0x26a   : > { %v1188_v11 = vmax.f32 %v1179_v9, 0.0 }
 0x26b   : > { %v1183_v12 = vpop.f32.mrb[18].mxu0 }
 0x26c   : > { %1191 = vst.msk [vmem:[%s258_s15 + $0x8] sm:$0xff] %vm418_vm4, %v1188_v11  ;;  %v1184_v13 = vadd.f32 %v1327_v4, %v1183_v12  ;;  %v1465_v14 = vpop.f32.mrb[19].mxu0 }
 0x26e   : > { %v1189_v15 = vmax.f32 %v1184_v13, 0.0 }
 0x270   : > { %1192 = vst.msk [vmem:[%s258_s15 + $0x10] sm:$0xff] %vm418_vm4, %v1189_v15 }
 0x271 PF: > { %s15_s20 = sadd.s32 1, %s1557_s20   ;;  %s1876_s18 = smov %s1553_s19 }
 0x272   : > { %p12_p5 = scmp.ge.s32.totalorder %s15_s20, 4   ;;  %s1877_s19 = smov %s1879_s21 }
 0x274   :  { %14 = sbr.rel (!%p12_p5) target bundleno = 2 (0x2), region = 75 }

</bundles_post_ra>
